<compile_context>
chip_gen: v7x
topology: tpu7x:2x2x1
jax: 0.10.0
libtpu: 0.0.40
codegen_flags: <defaults>
</compile_context>

<pallas_src>
import jax
import jax.numpy as jnp
from jax.experimental import pallas as pl
from jax.experimental.pallas import tpu as pltpu


def dyn_1storder_kernel(c_ref, z_ref, o_ref):
    # c_ref: (1,) scalar in SMEM holding dt * alpha.
    # z_ref/o_ref: (tile_m, D) lane-dense tiles in VMEM.
    z = z_ref[...]
    o_ref[...] = z - c_ref[0] * z


def _pick_tile_m(M, D, max_tile_bytes=4 << 20):
    """Largest row tile: multiple of 8, <= M, and tile_m*D*4 <= max_tile_bytes."""
    bytes_per_row = D * 4
    tile_m = max(1, min(M, max_tile_bytes // max(bytes_per_row, 1), 1024))
    if tile_m >= 8:
        tile_m = (tile_m // 8) * 8
    else:
        tile_m = M  # tiny inputs: single full-extent block (allowed by (8,128) rule)
    return tile_m


def dyn_1storder_forward(z, alpha, dt, tile_m=None):
    """z: float32 array of any rank (last dim = feature/lane dim).
    Returns y_hat = z - dt * alpha * z with the same shape as z."""
    orig_shape = z.shape
    D = orig_shape[-1]
    M = z.size // D
    z2 = z.reshape(M, D)

    if tile_m is None:
        tile_m = _pick_tile_m(M, D)
    tile_m = min(tile_m, M)

    # Fold the scalars once: c = dt * alpha (single SMEM operand).
    c = (jnp.asarray(dt, dtype=jnp.float32) * jnp.asarray(alpha, dtype=jnp.float32)).reshape(1)

    grid = (pl.cdiv(M, tile_m),)
    out2 = pl.pallas_call(
        dyn_1storder_kernel,
        out_shape=jax.ShapeDtypeStruct((M, D), jnp.float32),
        grid=grid,
        in_specs=[
            pl.BlockSpec(memory_space=pltpu.SMEM),             # c = dt*alpha (scalar)
            pl.BlockSpec((tile_m, D), lambda i: (i, 0)),        # z row tile
        ],
        out_specs=pl.BlockSpec((tile_m, D), lambda i: (i, 0)),
        compiler_params=pltpu.CompilerParams(
            dimension_semantics=("parallel",),
        ),
    )(c, z2)
    return out2.reshape(orig_shape)


if __name__ == "__main__":
    key = jax.random.PRNGKey(0)

    # Deterministic parameter init, matching nn.Module.__init__ (init_phys=None):
    alpha = jnp.float32(0.5)   # nn.Parameter alpha = 0.5
    beta = jnp.float32(0.5)    # unused in forward (kept for parity with the module)
    dt = 0.1

    # Small example input: (batch, channels, features) — elementwise op, so the
    # wrapper flattens leading dims onto sublanes and keeps D=128 on lanes.
    B, C, D = 4, 8, 128
    z = jax.random.normal(key, (B, C, D), dtype=jnp.float32)

    # tile_m=8 exercises a multi-step grid (M=32 rows -> grid=(4,)).
    y_hat = dyn_1storder_forward(z, alpha, dt, tile_m=8)
    y_hat = jax.block_until_ready(y_hat)

    # Pure-JAX reference check.
    ref = z - jnp.float32(dt) * alpha * z
    assert y_hat.shape == z.shape
    assert jnp.allclose(y_hat, ref, atol=1e-6, rtol=1e-6)

    print("KERNEL_OK")
</pallas_src>

<mosaic_0001>
module attributes {stable_mosaic.version = 11 : i64} {
  func.func @dyn_1storder_kernel(%arg0: i32, %arg1: memref<1xf32, #tpu.memory_space<smem>>, %arg2: memref<8x128xf32, #tpu.memory_space<vmem>>, %arg3: memref<8x128xf32, #tpu.memory_space<vmem>>) attributes {dimension_semantics = [#tpu.dimension_semantics<parallel>], iteration_bounds = array<i64: 4>, scalar_prefetch = 0 : i64, scratch_operands = 0 : i64, tpu.core_type = #tpu.core_type<tc>, window_params = [{transform_indices = @transform_0, window_bounds = array<i64: 1>}, {transform_indices = @transform_1, window_bounds = array<i64: 8, 128>}, {transform_indices = @transform_2, window_bounds = array<i64: 8, 128>}]} {
    %c0 = arith.constant 0 : index
    %c0_0 = arith.constant 0 : index
    %0 = vector.load %arg2[%c0, %c0_0] : memref<8x128xf32, #tpu.memory_space<vmem>>, vector<8x128xf32>
    %c0_1 = arith.constant 0 : index
    %1 = memref.load %arg1[%c0_1] : memref<1xf32, #tpu.memory_space<smem>>
    %2 = vector.broadcast %1 : f32 to vector<8x128xf32>
    %3 = arith.mulf %2, %0 : vector<8x128xf32>
    %4 = arith.subf %0, %3 : vector<8x128xf32>
    %c0_2 = arith.constant 0 : index
    %c0_3 = arith.constant 0 : index
    %5 = vector.load %arg3[%c0_2, %c0_3] : memref<8x128xf32, #tpu.memory_space<vmem>>, vector<8x128xf32>
    tpu.vector_store %arg3[%c0_2, %c0_3], %4 {strides = array<i32>} : memref<8x128xf32, #tpu.memory_space<vmem>>, vector<8x128xf32>,
    return
  }
  func.func @transform_0(%arg0: i32) -> i32 {
    %c0_i32 = arith.constant 0 : i32
    %c0_i32_0 = arith.constant 0 : i32
    return %c0_i32 : i32
  }
  func.func @transform_1(%arg0: i32) -> (i32, i32) {
    %c0_i32 = arith.constant 0 : i32
    %c0_i32_0 = arith.constant 0 : i32
    return %arg0, %c0_i32 : i32, i32
  }
  func.func @transform_2(%arg0: i32) -> (i32, i32) {
    %c0_i32 = arith.constant 0 : i32
    %c0_i32_0 = arith.constant 0 : i32
    return %arg0, %c0_i32 : i32, i32
  }
}

</mosaic_0001>

<bundles_post_ra>
// kernel: tpu_custom_call.1
= control target key start
LH: loop header
LB: loop body
LE: loop exit
PB: predicated region body
PF: predicated region fallthrough
CT: control target
= control target key end

     0   :  { %s585_s0 = inlined_call_operand.<no memory space> [shape: f32[1], index: 0, kind: input, shape index: {}]   ;;  %s586_s1 = inlined_call_operand.hbm [shape: f32[32,128], index: 1, kind: input, shape index: {}]   ;;  %s587_s2 = inlined_call_operand.hbm [shape: f32[32,128], index: 2, kind: output, shape index: {}]  }
   0x1   :  { %7 = sst [smem:[#allocation2]] %s585_s0 }
   0x2   :  { %8 = vsyncpa [#allocation4], 0 }
   0x3   :  { %10 = vsyncpa [#allocation4 + $0x1], 0 }
   0x4   :  { %11 = vsyncpa [#allocation5], 0 }
   0x5   :  { %13 = vsyncpa [#allocation5 + $0x1], 0  ;;  %s426_s11 = smov 0   ;;  %s428_s12 = smov 0  }
   0x6   :  { %s430_s13 = smov 0   ;;  %s432_s14 = smov 0  }
   0x7 LB: > { %s447_s0 = sadd.s32 4294967295, %s404_s14   ;;  %s250_s15 = sadd.s32 4294967294, %s404_s14   ;;  %s404_s14 = sphi %s432_s14, %s601_s14   ;;  %s400_s13 = sphi %s430_s13, %s600_s13   ;;  %s396_s12 = sphi %s428_s12, %s599_s12   ;;  %s392_s11 = sphi %s426_s11, %s598_s11  }
   0x8   : > { %s451_s16 = sadd.s32 1, %s404_s14   ;;  %s47_s17 = sadd.s32 1, %s400_s13 }
   0x9   : > { %s44_s18 = ssub.s32 %s404_s14, %s451_s16  ;;  %p54_p0 = scmp.ne.s32.totalorder %s400_s13, %s396_s12 }
   0xa   : > { %p45_p1 = scmp.eq.s32.totalorder %s44_s18, 0  ;;  %p55_p2 = scmp.eq.s32.totalorder %s404_s14, 0 }
   0xb   : > { %p60_p3 = scmp.ne.s32.totalorder %s396_s12, %s392_s11  ;;  %p61_p4 = scmp.eq.s32.totalorder %s447_s0, 0 }
   0xc   : > { %s463_s19 = scalar_select %p45_p1, %s400_s13, %s47_s17  }
   0xd   : > { %p465_p5 = por %p55_p2, %p54_p0  ;;  %p469_p6 = por %p61_p4, %p60_p3 }
   0xe   : > { %p84_p7 = scmp.eq.s32.totalorder %s447_s0, 3  ;;  %p90_p8 = scmp.eq.s32.totalorder %s250_s15, 3 }
   0xf   : > { %p274_p9 = scmp.lt.s32.totalorder %s404_s14, 4  ;;  %s113_s24 = sand.u32 1, %s400_s13  }
  0x10   : > { %p475_p10 = por %p84_p7, %p54_p0  ;;  %p479_p11 = por %p90_p8, %p60_p3 }
  0x11   : > { %s254_s25 = sshll.u32 %s404_s14, 7  ;;  %s253_s26 = sshll.u32 %s113_s24, 3 }
  0x12   : > { %s591_s22 = scalar_select %p475_p10, 1, 0 }
  0x13   : > { %s592_s23 = scalar_select %p479_p11, 1, 0 }
  0x14   : > { %s488_s29 = scalar_lea.hbm %s586_s1, %s254_s25  ;;  %s117_s30 = scalar_lea.vmem [#allocation3], %s253_s26 }
  0x15   : > { %s124_s3 = sshll.u32 %s117_s30, 4  ;;  %p492_p12 = pnand %p274_p9, %p465_p5  ;;  %s496_s3 = int_to_ptr.vmem [resolvable:$true] %s124_s3 }
  0x16   : > { %s114_s5 = scalar_lea.sflag [#allocation4], %s113_s24  ;;  %s308_s6 = scalar_lea.hbm %s488_s29, 128 }
  0x17   : > { %p309_p1 = scmp.ne.s32.totalorder %s488_s29, %s308_s6  ;;  %p310_p2 = pneg %p492_p12 }
  0x18   : > { %s313_s9 = scalar_lea.hbm %s586_s1, 512  ;;  %p314_p5 = scmp.lt.u32.totalorder %s488_s29, %s586_s1 }
  0x19   : > { %p311_p3 = pnand %p310_p2, %p309_p1  ;;  %p315_p7 = scmp.lt.u32.totalorder %s313_s9, %s308_s6 }
  0x1a   : > { %p317_p9 = scmp.lt.u32.totalorder %s308_s6, %s488_s29 }
  0x1b   : > { %p312_p4 = pneg %p311_p3  ;;  %p316_p8 = por %p315_p7, %p314_p5 }
  0x1d   : > { %p318_p13 = por %p317_p9, %p316_p8 }
  0x1f   : > { %p319_p0 = pnand %p318_p13, %p312_p4 }
  0x21   : > { %322 = shalt.err (!%p319_p0)
}
  0x22   : > { %s323_s17 = scalar_lea.vmem %s496_s3, 128  ;;  %s406_s18 = smov [#allocation3]  }
  0x23   : > { %p324_p1 = scmp.ne.s32.totalorder %s496_s3, %s323_s17  ;;  %s328_s20 = sshll.u32 %s406_s18, 4  ;;  %s329_s20 = int_to_ptr.vmem [resolvable:$false] %s328_s20 }
  0x24   : > { %s330_s24 = scalar_lea.vmem %s329_s20, 256  ;;  %p331_p10 = scmp.lt.s32.totalorder %s496_s3, %s329_s20 }
  0x25   : > { %p326_p3 = pnand %p324_p1, %p310_p2  ;;  %p332_p5 = scmp.lt.s32.totalorder %s330_s24, %s323_s17 }
  0x27   : > { %p327_p11 = pneg %p326_p3  ;;  %p333_p7 = por %p332_p5, %p331_p10 }
  0x29   : > { %p334_p8 = pnand %p333_p7, %p327_p11 }
  0x2b   : > { %337 = shalt.err (!%p334_p8)
}
  0x2c   : > { %269 = dma.hbm_to_vmem [thread:$0]  (!%p492_p12), %s488_s29, 128, %s496_s3, %s114_s5  }
  0x2d   : > { %p594_p13 = scmp.lt.s32.totalorder %s404_s14, 5  ;;  %p595_p0 = scmp.ge.s32.totalorder %s404_s14, 1 }
  0x2f   : > { %p130_p2 = pnand %p595_p0, %p594_p13 }
  0x30   : > { %s530_s25 = sand.u32 (!%p130_p2), 1, %s396_s12  }
  0x31   : > { %133 = sbr.rel (%p130_p2) target bundleno = 83 (0x53), region = 28  ;;  %s256_s26 = sshll.u32 (!%p130_p2), %s530_s25, 3 }
  0x32   : > { %s136_s27 = scalar_lea.sflag (!%p130_p2), [#allocation4], %s530_s25  ;;  %s139_s28 = scalar_lea.vmem (!%p130_p2), [#allocation3], %s256_s26 }
  0x38   : > { %383 = dma.done.wait (%p469_p6), %s136_s27, 128  }
  0x39   : > { %385 = vsyncadd (%p469_p6), %s136_s27, 4294967168  ;;  %s161_s29 = sld [smem:[#allocation2]]  ;;  %v160_v1 = vld [vmem:[%s139_s28] sm:$0xff]  ;;  %s159_s30 = scalar_lea.vmem [#allocation6], %s256_s26 }
  0x3a   : > { %s180_s3 = sshll.u32 %s159_s30, 4  ;;  %s259_s4 = sshll.u32 %s447_s0, 7  ;;  %s539_s3 = int_to_ptr.vmem [resolvable:$true] %s180_s3 }
  0x3b   : > { %s544_s21 = scalar_lea.hbm %s587_s2, %s259_s4  ;;  %s167_s7 = scalar_lea.sflag [#allocation5], %s530_s25 }
  0x3c   : > { %s338_s8 = scalar_lea.vmem %s539_s3, 128  ;;  %p596_p10 = scmp.ne.s32.totalorder %s591_s22, 0 }
  0x3d   : > { %p339_p6 = scmp.ne.s32.totalorder %s539_s3, %s338_s8  ;;  %s407_s0 = smov [#allocation6]  }
  0x3e   : > { %s342_s9 = sshll.u32 %s407_s0, 4  ;;  %s343_s9 = int_to_ptr.vmem [resolvable:$false] %s342_s9 }
  0x3f   : > { %v162_v0 = vstv %s161_s29  ;;  %p340_p11 = pnand %p339_p6, %p596_p10  ;;  %s344_s10 = scalar_lea.vmem %s343_s9, 256 }
  0x40   : > { %v163_v2 = vmul.f32 %v162_v0, %v160_v1  ;;  %p345_p4 = scmp.lt.s32.totalorder %s539_s3, %s343_s9  ;;  %p346_p9 = scmp.lt.s32.totalorder %s344_s10, %s338_s8 }
  0x41   : > { %p341_p12 = pneg %p340_p11 }
  0x42   : > { %v164_v3 = vsub.f32 %v160_v1, %v163_v2  ;;  %p347_p1 = por %p346_p9, %p345_p4 }
  0x44   : > { %165 = vst [vmem:[%s159_s30] sm:$0xff] %v164_v3  ;;  %p348_p3 = pnand %p347_p1, %p341_p12 }
  0x46   : > { %351 = shalt.err (!%p348_p3)
}
  0x47   : > { %s352_s15 = scalar_lea.hbm %s544_s21, 128  ;;  %s356_s20 = scalar_lea.hbm %s587_s2, 512 }
  0x48   : > { %p353_p5 = scmp.ne.s32.totalorder %s544_s21, %s352_s15  ;;  %p357_p13 = scmp.lt.u32.totalorder %s544_s21, %s587_s2 }
  0x49   : > { %p358_p0 = scmp.lt.u32.totalorder %s356_s20, %s352_s15  ;;  %p360_p6 = scmp.lt.u32.totalorder %s352_s15, %s544_s21 }
  0x4a   : > { %p354_p7 = pnand %p353_p5, %p596_p10 }
  0x4b   : > { %p359_p2 = por %p358_p0, %p357_p13 }
  0x4c   : > { %p355_p8 = pneg %p354_p7 }
  0x4d   : > { %p361_p11 = por %p360_p6, %p359_p2 }
  0x4f   : > { %p362_p12 = pnand %p361_p11, %p355_p8 }
  0x51   : > { %365 = shalt.err (!%p362_p12)
}
  0x52   : > { %264 = dma.vmem_to_hbm [thread:$0]  (%p596_p10), %s539_s3, 128, %s544_s21, %s167_s7  }
  0x53 PF: > { %p275_p4 = scmp.ge.s32.totalorder %s404_s14, 2  ;;  %s192_s26 = sand.u32 1, %s392_s11  }
  0x54   : > { %p597_p9 = scmp.ne.s32.totalorder %s592_s23, 0  ;;  %s193_s27 = scalar_lea.sflag [#allocation5], %s192_s26 }
  0x56   : > { %p271_p1 = pnand %p275_p4, %p597_p9 }
  0x58   : > { %387 = dma.done.wait (!%p271_p1), %s193_s27, 128  }
  0x59   : > { %389 = vsyncadd (!%p271_p1), %s193_s27, 4294967168  ;;  %p16_p3 = scmp.ge.s32.totalorder %s451_s16, 6   ;;  %s598_s11 = smov %s396_s12 }
  0x5a   : > { %s599_s12 = smov %s400_s13  ;;  %s600_s13 = smov %s463_s19 }
  0x5b   : > { %s601_s14 = smov %s451_s16  ;;  %18 = sbr.rel (!%p16_p3) target bundleno = 7 (0x7), region = 73 }
  0x62   :  { %198 = vsyncpa [#allocation4], 1 }
  0x63   :  { %200 = vsyncpa [#allocation4 + $0x1], 1 }
  0x64   :  { %201 = vsyncpa [#allocation5], 1 }
  0x65   :  { %203 = vsyncpa [#allocation5 + $0x1], 1 }

</bundles_post_ra>
